<compile_context>
chip_gen: v7x
topology: tpu7x:2x2x1
jax: 0.10.0
libtpu: 0.0.40
codegen_flags: <defaults>
</compile_context>

<pallas_src>
import numpy as np
import jax
import jax.numpy as jnp
from jax.experimental import pallas as pl
from jax.experimental.pallas import tpu as pltpu

_LANES = 128            # TPU vreg lane width
_ROW_TILE = 2048        # packed-row tile: 1 MiB f32 output block per buffer
_SPLIT_MIN_ROWS = 512   # above this, force grid >= 2 (v7x has 2 TensorCores)


def _cdiv(a: int, b: int) -> int:
    return -(-a // b)


def _make_time_embed_kernel(group: int):
    """Kernel closure; `group` (batch elems packed per 128-lane row) is static."""

    def kernel(t_ref, cb_ref, o_ref):
        # t_ref:  (TR, G)    f32  packed time, G batch elements per output row
        # cb_ref: (G+1, W)   f32  rows 0..G-1: group-masked interleaved 2*pi*freq
        #                          row  G    : phase bias (0 sin / pi/2 cos lane)
        # o_ref:  (TR, W)    out_dtype
        phase = cb_ref[group:group + 1, :]                    # (1, W) bias row
        for j in range(group):                                # static unroll (G<=4)
            # (TR,1) lane-broadcast  *  (1,W) sublane-broadcast  -> (TR,W), dense.
            phase = phase + t_ref[:, j:j + 1] * cb_ref[j:j + 1, :]
        o_ref[...] = jnp.sin(phase).astype(o_ref.dtype)       # one EUP op / element

    return kernel


class SinosoidalTimeEmbedder:
    """JAX/Pallas port of the PyTorch SinosoidalTimeEmbedder forward pass."""

    def __init__(self, embed_len: int, max_freq: float = 10.0,
                 base: float = 1000.0, rand_flag: bool = False,
                 out_dtype=jnp.float32):
        assert embed_len % 2 == 0
        self.embed_len = embed_len
        self.out_dtype = out_dtype

        if rand_flag:
            # TODO(synk): torch.rand init cannot be reproduced bit-exactly here.
            power = np.asarray(jax.random.uniform(
                jax.random.PRNGKey(42), (embed_len // 2,), dtype=jnp.float32))
        else:
            power = np.linspace(0.0, 1.0, embed_len // 2, dtype=np.float32)
        freq = (max_freq / np.power(np.float32(base), power)).astype(np.float32)

        # Interleave so columns 2j, 2j+1 both carry freq[j]; fold in 2*pi.
        freq_il = np.empty((embed_len,), np.float32)
        freq_il[0::2] = freq
        freq_il[1::2] = freq
        freq_il *= np.float32(2.0 * np.pi)
        # Even columns -> sin (bias 0); odd columns -> cos == sin(x + pi/2).
        bias = np.where(np.arange(embed_len) % 2 == 0,
                        0.0, 0.5 * np.pi).astype(np.float32)

        # Lane packing: `group` batch elements per 128-lane output row.
        if embed_len % _LANES == 0:
            self.group = 1
        elif _LANES % embed_len == 0:
            self.group = _LANES // embed_len
        else:
            self.group = 1   # fallback: correct, stores partially masked
        g = self.group
        self.width = g * embed_len

        # One constant block: g group-masked freq rows + 1 bias row.
        cb = np.zeros((g + 1, self.width), np.float32)
        for j in range(g):
            cb[j, j * embed_len:(j + 1) * embed_len] = freq_il
        cb[g, :] = np.tile(bias, g)
        self.const_block = jnp.asarray(cb)

        self._kernel = _make_time_embed_kernel(g)
        # f32 sublane tile = 8 rows; bf16 needs 16.
        self._row_align = 8 if jnp.dtype(out_dtype).itemsize == 4 else 16

    def __call__(self, time: jax.Array) -> jax.Array:
        n = time.shape[0]
        e, g, w = self.embed_len, self.group, self.width

        rows = _cdiv(n, g)                              # packed output rows
        grid_rows = max(1, _cdiv(rows, _ROW_TILE))
        if grid_rows == 1 and rows >= _SPLIT_MIN_ROWS:
            grid_rows = 2                               # v7x: use both TCs
        if grid_rows > 1 and (grid_rows % 2):
            grid_rows += 1                              # balanced across 2 TCs
        block_rows = _cdiv(_cdiv(rows, grid_rows), self._row_align) * self._row_align
        rows_padded = grid_rows * block_rows            # adaptive tail padding

        # Wrapper-side plumbing is now tiny: pad + reshape to (rows, g).
        t = time.astype(jnp.float32).reshape(n)
        t = jnp.pad(t, (0, rows_padded * g - n))
        t2d = t.reshape(rows_padded, g)

        out = pl.pallas_call(
            self._kernel,
            out_shape=jax.ShapeDtypeStruct((rows_padded, w), self.out_dtype),
            grid=(grid_rows,),
            in_specs=[
                pl.BlockSpec((block_rows, g), lambda i: (i, 0)),   # packed time
                pl.BlockSpec((g + 1, w), lambda i: (0, 0)),        # freq+bias consts
            ],
            out_specs=pl.BlockSpec((block_rows, w), lambda i: (i, 0)),
            compiler_params=pltpu.CompilerParams(
                dimension_semantics=("parallel",),
                vmem_limit_bytes=32 * 1024 * 1024),
        )(t2d, self.const_block)

        # Row r, lanes [j*e:(j+1)*e] hold the embedding of batch element r*g+j.
        emb = out.reshape(rows_padded * g, e)
        if rows_padded * g == n:
            return emb                  # no slice copy when batch packs exactly
        return emb[:n]


def _reference(time, embed_len, max_freq=10.0, base=1000.0):
    power = jnp.linspace(0.0, 1.0, embed_len // 2, dtype=jnp.float32)
    freq = max_freq / jnp.power(base, power)
    phase = 2.0 * np.pi * time[:, None] * freq[None, :]
    out = jnp.zeros((time.shape[0], embed_len), dtype=jnp.float32)
    out = out.at[:, 0::2].set(jnp.sin(phase))
    out = out.at[:, 1::2].set(jnp.cos(phase))
    return out


if __name__ == "__main__":
    key = jax.random.PRNGKey(0)

    # Case 1: embed_len=32 (group=4 lane packing), tiny batch, single grid step.
    embedder32 = SinosoidalTimeEmbedder(embed_len=32)
    n_small = 8
    time_small = jax.random.uniform(key, (n_small,), dtype=jnp.float32)
    out_small = jax.block_until_ready(embedder32(time_small))
    ref_small = _reference(time_small, 32)
    # atol 5e-5: re-associated 2*pi*t*freq and sin(x+pi/2)==cos(x) differ from
    # the reference by a few f32 ulps of a phase that can reach ~2*pi*max_freq.
    np.testing.assert_allclose(np.asarray(out_small), np.asarray(ref_small),
                               rtol=1e-5, atol=5e-5)

    # Case 2: larger batch exercising grid=2 (dual-TC split) + adaptive padding
    # (n=2500 -> rows=625 -> block_rows=320, rows_padded=640, ~2% waste).
    n_big = 2500
    time_big = jax.random.uniform(jax.random.PRNGKey(1), (n_big,), dtype=jnp.float32)
    out_big = jax.block_until_ready(embedder32(time_big))
    ref_big = _reference(time_big, 32)
    np.testing.assert_allclose(np.asarray(out_big), np.asarray(ref_big),
                               rtol=1e-5, atol=5e-5)

    # Case 3: embed_len=128 (group=1 path), small batch.
    embedder128 = SinosoidalTimeEmbedder(embed_len=128)
    n128 = 16
    time_128 = jax.random.uniform(jax.random.PRNGKey(2), (n128,), dtype=jnp.float32)
    out_128 = jax.block_until_ready(embedder128(time_128))
    ref_128 = _reference(time_128, 128)
    np.testing.assert_allclose(np.asarray(out_128), np.asarray(ref_128),
                               rtol=1e-5, atol=5e-5)

    print("KERNEL_OK")
</pallas_src>

<mosaic_0001>
module attributes {stable_mosaic.version = 11 : i64} {
  func.func @kernel(%arg0: i32, %arg1: memref<8x4xf32, #tpu.memory_space<vmem>>, %arg2: memref<5x128xf32, #tpu.memory_space<vmem>>, %arg3: memref<8x128xf32, #tpu.memory_space<vmem>>) attributes {dimension_semantics = [#tpu.dimension_semantics<parallel>], iteration_bounds = array<i64: 1>, scalar_prefetch = 0 : i64, scratch_operands = 0 : i64, tpu.core_type = #tpu.core_type<tc>, window_params = [{transform_indices = @transform_0, window_bounds = array<i64: 8, 4>}, {pipeline_mode = #tpu.pipeline_mode<synchronous>, transform_indices = @transform_1, window_bounds = array<i64: 5, 128>}, {transform_indices = @transform_2, window_bounds = array<i64: 8, 128>}]} {
    %c4 = arith.constant 4 : index
    %c0 = arith.constant 0 : index
    %0 = vector.load %arg2[%c4, %c0] : memref<5x128xf32, #tpu.memory_space<vmem>>, vector<1x128xf32>
    %c0_0 = arith.constant 0 : index
    %c0_1 = arith.constant 0 : index
    %1 = vector.load %arg1[%c0_0, %c0_1] : memref<8x4xf32, #tpu.memory_space<vmem>>, vector<8x1xf32>
    %c0_2 = arith.constant 0 : index
    %c0_3 = arith.constant 0 : index
    %2 = vector.load %arg2[%c0_2, %c0_3] : memref<5x128xf32, #tpu.memory_space<vmem>>, vector<1x128xf32>
    %3 = vector.broadcast %1 : vector<8x1xf32> to vector<8x128xf32>
    %4 = vector.broadcast %2 : vector<1x128xf32> to vector<8x128xf32>
    %5 = arith.mulf %3, %4 : vector<8x128xf32>
    %6 = vector.broadcast %0 : vector<1x128xf32> to vector<8x128xf32>
    %7 = arith.addf %6, %5 : vector<8x128xf32>
    %c0_4 = arith.constant 0 : index
    %c1 = arith.constant 1 : index
    %8 = vector.load %arg1[%c0_4, %c1] : memref<8x4xf32, #tpu.memory_space<vmem>>, vector<8x1xf32>
    %c1_5 = arith.constant 1 : index
    %c0_6 = arith.constant 0 : index
    %9 = vector.load %arg2[%c1_5, %c0_6] : memref<5x128xf32, #tpu.memory_space<vmem>>, vector<1x128xf32>
    %10 = vector.broadcast %8 : vector<8x1xf32> to vector<8x128xf32>
    %11 = vector.broadcast %9 : vector<1x128xf32> to vector<8x128xf32>
    %12 = arith.mulf %10, %11 : vector<8x128xf32>
    %13 = arith.addf %7, %12 : vector<8x128xf32>
    %c0_7 = arith.constant 0 : index
    %c2 = arith.constant 2 : index
    %14 = vector.load %arg1[%c0_7, %c2] : memref<8x4xf32, #tpu.memory_space<vmem>>, vector<8x1xf32>
    %c2_8 = arith.constant 2 : index
    %c0_9 = arith.constant 0 : index
    %15 = vector.load %arg2[%c2_8, %c0_9] : memref<5x128xf32, #tpu.memory_space<vmem>>, vector<1x128xf32>
    %16 = vector.broadcast %14 : vector<8x1xf32> to vector<8x128xf32>
    %17 = vector.broadcast %15 : vector<1x128xf32> to vector<8x128xf32>
    %18 = arith.mulf %16, %17 : vector<8x128xf32>
    %19 = arith.addf %13, %18 : vector<8x128xf32>
    %c0_10 = arith.constant 0 : index
    %c3 = arith.constant 3 : index
    %20 = vector.load %arg1[%c0_10, %c3] : memref<8x4xf32, #tpu.memory_space<vmem>>, vector<8x1xf32>
    %c3_11 = arith.constant 3 : index
    %c0_12 = arith.constant 0 : index
    %21 = vector.load %arg2[%c3_11, %c0_12] : memref<5x128xf32, #tpu.memory_space<vmem>>, vector<1x128xf32>
    %22 = vector.broadcast %20 : vector<8x1xf32> to vector<8x128xf32>
    %23 = vector.broadcast %21 : vector<1x128xf32> to vector<8x128xf32>
    %24 = arith.mulf %22, %23 : vector<8x128xf32>
    %25 = arith.addf %19, %24 : vector<8x128xf32>
    %26 = math.sin %25 : vector<8x128xf32>
    %c0_13 = arith.constant 0 : index
    %c0_14 = arith.constant 0 : index
    %27 = vector.load %arg3[%c0_13, %c0_14] : memref<8x128xf32, #tpu.memory_space<vmem>>, vector<8x128xf32>
    tpu.vector_store %arg3[%c0_13, %c0_14], %26 {strides = array<i32>} : memref<8x128xf32, #tpu.memory_space<vmem>>, vector<8x128xf32>,
    return
  }
  func.func @transform_0(%arg0: i32) -> (i32, i32) {
    %c0_i32 = arith.constant 0 : i32
    %c0_i32_0 = arith.constant 0 : i32
    return %arg0, %c0_i32 : i32, i32
  }
  func.func @transform_1(%arg0: i32) -> (i32, i32) {
    %c0_i32 = arith.constant 0 : i32
    %c0_i32_0 = arith.constant 0 : i32
    %c0_i32_1 = arith.constant 0 : i32
    return %c0_i32, %c0_i32_0 : i32, i32
  }
  func.func @transform_2(%arg0: i32) -> (i32, i32) {
    %c0_i32 = arith.constant 0 : i32
    %c0_i32_0 = arith.constant 0 : i32
    return %arg0, %c0_i32 : i32, i32
  }
}

</mosaic_0001>

<bundles_post_ra>
// kernel: tpu_custom_call.1
= control target key start
LH: loop header
LB: loop body
LE: loop exit
PB: predicated region body
PF: predicated region fallthrough
CT: control target
= control target key end

     0   :  { %v239_v1 = vmov 0   ;;  %v240_v2 = vmov 2   ;;  %s316_s0 = inlined_call_operand.vmem [shape: f32[8,4], index: 0, kind: input, shape index: {}]   ;;  %s317_s1 = inlined_call_operand.vmem [shape: f32[5,128], index: 1, kind: input, shape index: {}]   ;;  %s318_s2 = inlined_call_operand.hbm [shape: f32[8,128], index: 2, kind: output, shape index: {}]  }
   0x1   :  { %v13_v0 = vld [vmem:[%s316_s0] sm:$0xff]  ;;  %206 = vset.pattern.permute.xlu0 %v239_v1  ;;  %208 = vset.pattern.permute.xlu1 %v240_v2 }
   0x2   :  { %7 = vsyncpa [#allocation3], 0  ;;  %17 = vperm.xlu0 %206, %v13_v0   ;;  %43 = vperm.xlu1 %208, %v13_v0   ;;  %v241_v3 = vmov 1   ;;  %v242_v4 = vmov 3   ;;  %v182_v5 = vld [vmem:[%s317_s1] ss:$0 sm:$0xff] }
   0x3   :  { %v183_v9 = vld [vmem:[%s317_s1 + $0x4] ss:$0 sm:$0xff]  ;;  %v184_v10 = vld [vmem:[%s317_s1 + $0x1] ss:$0 sm:$0xff]  ;;  %v185_v11 = vld [vmem:[%s317_s1 + $0x2] ss:$0 sm:$0xff] }
   0x4   :  { %v186_v13 = vld [vmem:[%s317_s1 + $0x3] ss:$0 sm:$0xff]  ;;  %v243_v33 = vmov 2102212464   ;;  %v244_v35 = vmov 920167782  }
   0x5   :  { %v245_v39 = vmov 1326507024   ;;  %v246_v41 = vmov 683565275   ;;  %v247_v43 = vmov 2475754826  }
   0x6   :  { %207 = vset.pattern.permute.xlu0 %v241_v3  ;;  %209 = vset.pattern.permute.xlu1 %v242_v4  ;;  %v248_v46 = vmov 2131351028   ;;  %s249_s1 = smov [#allocation2]  }
   0x7   :  { %32 = vperm.xlu0 %207, %v13_v0   ;;  %54 = vperm.xlu1 %209, %v13_v0   ;;  %s174_s20 = sshll.u32 %s249_s1, 4  ;;  %s175_s20 = int_to_ptr.vmem [resolvable:$true] %s174_s20 }
   0x8   :  { %s215_s21 = scalar_lea.vmem %s175_s20, 128  ;;  %p220_p1 = scmp.lt.s32.totalorder %s175_s20, %s175_s20 }
   0x9   :  { %p216_p0 = scmp.ne.s32.totalorder %s175_s20, %s215_s21  ;;  %p221_p2 = scmp.lt.s32.totalorder %s215_s21, %s215_s21 }
   0xb   :  { %210 = vset.pattern.permute.xlu0 %v242_v4  ;;  %p222_p3 = por %p221_p2, %p220_p1 }
   0xd   :  { %p223_p4 = pnand %p222_p3, %p216_p0 }
  0x81   :  { %v18_v6 = vpop.permute.xlu0 %17  ;;  %v44_v7 = vpop.permute.xlu1 %43 }
  0x82   :  { %v24_v8 = vmul.f32 %v182_v5, %v18_v6  ;;  %v50_v17 = vmul.f32 %v185_v11, %v44_v7 }
  0x84   :  { %v29_v15 = vadd.f32 %v183_v9, %v24_v8 }
  0x86   :  { %v33_v12 = vpop.permute.xlu0 %32  ;;  %v55_v14 = vpop.permute.xlu1 %54 }
  0x87   :  { %v39_v16 = vmul.f32 %v184_v10, %v33_v12  ;;  %v61_v19 = vmul.f32 %v186_v13, %v55_v14 }
  0x89   :  { %v40_v18 = vadd.f32 %v39_v16, %v29_v15 }
  0x8b   :  { %v51_v20 = vadd.f32 %v50_v17, %v40_v18 }
  0x8d   :  { %v283_v21 = vadd.f32 %v61_v19, %v51_v20 }
  0x8f   :  { %v66_v22 = vand.u32 2139095040, %v283_v21  ;;  %v63_v23 = vand.u32 2147483647, %v283_v21  ;;  %vm65_vm7 = vcmp.lt.s32.totalorder %v283_v21, 0  ;;  %vm155_vm12 = vweird.f32 %v283_v21 }
  0x91   :  { %v67_v24 = vshrl.u32 %v66_v22, 23  ;;  %v70_v26 = vand.u32 8388607, %v63_v23  ;;  %vm64_vm8 = vcmp.le.f32.partialorder %v63_v23, 0.7853982 }
  0x93   :  { %v187_v25 = vadd.s32 4294967169, %v67_v24  ;;  %v71_v29 = vor.u32 8388608, %v70_v26 }
  0x95   :  { %v73_v27 = vadd.s32 1, %v187_v25  ;;  %v111_v37 = vshll.u32 %v71_v29, 8 }
  0x97   :  { %vm74_vm0 = vcmp.gt.s32.totalorder %v73_v27, 0 }
  0x98   :  { %v75_v28 = vsel %vm74_vm0, %v73_v27, 0 }
  0x99   :  { %v77_v30 = vand.u32 31, %v75_v28  ;;  %v76_v31 = vshrl.u32 %v75_v28, 5 }
  0x9b   :  { %v78_v32 = vsub.s32 32, %v77_v30  ;;  %v89_v34 = vshll.u32 %v243_v33, %v77_v30  ;;  %v92_v36 = vshll.u32 %v244_v35, %v77_v30  ;;  %v80_v42 = vshll.u32 %v246_v41, %v77_v30 }
  0x9c   :  { %v83_v45 = vshll.u32 %v247_v43, %v77_v30  ;;  %v86_v48 = vshll.u32 %v248_v46, %v77_v30  ;;  %vm98_vm1 = vcmp.lt.s32.totalorder %v76_v31, 4  ;;  %vm95_vm2 = vcmp.lt.s32.totalorder %v76_v31, 1 }
  0x9d   :  { %v90_v38 = vshrl.u32 %v244_v35, %v78_v32  ;;  %v93_v40 = vshrl.u32 %v245_v39, %v78_v32  ;;  %v81_v44 = vshrl.u32 %v247_v43, %v78_v32  ;;  %v84_v47 = vshrl.u32 %v248_v46, %v78_v32 }
  0x9e   :  { %v87_v49 = vshrl.u32 %v243_v33, %v78_v32  ;;  %v79_v53 = vshrl.u32 %v246_v41, %v78_v32  ;;  %vm96_vm3 = vcmp.lt.s32.totalorder %v76_v31, 2  ;;  %vm97_vm4 = vcmp.lt.s32.totalorder %v76_v31, 3 }
  0x9f   :  { %v91_v50 = vor.u32 %v90_v38, %v89_v34  ;;  %v94_v51 = vor.u32 %v93_v40, %v92_v36  ;;  %v82_v52 = vor.u32 %v81_v44, %v80_v42  ;;  %v85_v54 = vor.u32 %v84_v47, %v83_v45 }
  0xa0   :  { %v88_v55 = vor.u32 %v87_v49, %v86_v48 }
  0xa1   :  { %v104_v56 = vsel %vm98_vm1, %v91_v50, 920167782  ;;  %v108_v57 = vsel %vm98_vm1, %v94_v51, 1326507024  ;;  %v103_v59 = vsel %vm95_vm2, %v82_v52, %v85_v54  ;;  %v99_v62 = vsel %vm95_vm2, %v79_v53, %v82_v52 }
  0xa2   :  { %v100_v58 = vsel %vm98_vm1, %v88_v55, 2102212464  ;;  %v105_v60 = vsel %vm97_vm4, %v88_v55, %v104_v56  ;;  %v107_v61 = vsel %vm95_vm2, %v85_v54, %v88_v55  ;;  %v109_v1 = vsel %vm97_vm4, %v91_v50, %v108_v57 }
  0xa3   :  { %v101_v63 = vsel %vm97_vm4, %v85_v54, %v100_v58  ;;  %v106_v0 = vsel %vm96_vm3, %v103_v59, %v105_v60  ;;  %v110_v2 = vsel %vm96_vm3, %v107_v61, %v109_v1 }
  0xa4   :  { %v289_v3 = vmul.u32.u64.low %v111_v37, %v106_v0  ;;  %v290_v4 = vmul.u32.u64.high %v111_v37, %v106_v0, %v289_v3  ;;  %v292_v5 = vmul.u32.u64.low %v111_v37, %v110_v2  ;;  %v293_v6 = vmul.u32.u64.high %v111_v37, %v110_v2, %v292_v5 }
  0xa5   :  { %v102_v7 = vsel %vm96_vm3, %v99_v62, %v101_v63 }
  0xa6   :  { %v121_v8 = vadd.s32 1, %v290_v4  ;;  %v118_v9 = vmul.u32 %v111_v37, %v102_v7  ;;  %vm120_vm5 = vc.u32 %v293_v6, %v289_v3  ;;  %v119_v22 = vadd.s32 %v289_v3, %v293_v6 }
  0xa8   :  { %v122_v10 = vsel %vm120_vm5, %v121_v8, %v290_v4 }
  0xa9   :  { %v123_v11 = vadd.s32 %v122_v10, %v118_v9 }
  0xab   :  { %v124_v12 = vadd.s32 536870912, %v123_v11 }
  0xad   :  { %v125_v13 = vshrl.u32 %v124_v12, 30 }
  0xaf   :  { %v126_v14 = vshll.u32 %v125_v13, 30  ;;  %v149_v35 = vsub.s32 4, %v125_v13 }
  0xb1   :  { %v127_v15 = vsub.s32 %v123_v11, %v126_v14  ;;  %v150_v38 = vsel %vm65_vm7, %v149_v35, %v125_v13 }
  0xb2   :  { %v152_v40 = vsel %vm64_vm8, 0, %v150_v38 }
  0xb3   :  { %v129_v16 = vsub.s32 0, %v127_v15  ;;  %v156_v41 = vadd.s32 3, %v152_v40 }
  0xb5   :  { %v188_v17 = vmin.u32 %v129_v16, %v127_v15  ;;  %v157_v42 = vand.u32 3, %v156_v41 }
  0xb7   :  { %v131_v18 = vclz %v188_v17  ;;  %vm162_vm9 = vcmp.eq.s32.totalorder %v157_v42, 2  ;;  %vm159_vm10 = vcmp.eq.s32.totalorder %v157_v42, 0  ;;  %vm158_vm11 = vcmp.lt.s32.totalorder %v157_v42, 2 }
  0xb9   :  { %v189_v19 = vadd.s32 4294967294, %v131_v18 }
  0xbb   :  { %vm190_vm6 = vcmp.lt.s32.totalorder %v189_v19, 0 }
  0xbc   :  { %v134_v20 = vsel %vm190_vm6, 0, %v189_v19 }
  0xbd   :  { %v135_v24 = vsub.s32 32, %v134_v20  ;;  %v139_v25 = vsub.s32 4294967266, %v134_v20  ;;  %v136_v26 = vshll.u32 %v127_v15, %v134_v20 }
  0xbf   :  { %v137_v27 = vshrl.u32 %v119_v22, %v135_v24  ;;  %v140_v28 = vadd.s32 127, %v139_v25 }
  0xc1   :  { %v138_v29 = vor.u32 %v137_v27, %v136_v26  ;;  %v141_v30 = vshll.u32 %v140_v28, 23 }
  0xc3   :  { %v142_v31 = vor.u32 4788187, %v141_v30  ;;  %v145_v33 = vcvt.s32.f32 %v138_v29 }
  0xc5   :  { %v143_v32 = vand.u32 2147483647, %v142_v31 }
  0xc7   :  { %v146_v34 = vmul.f32 %v145_v33, %v143_v32 }
  0xc9   :  { %v147_v36 = vxor.u32 2147483648, %v146_v34 }
  0xcb   :  { %v148_v37 = vsel %vm65_vm7, %v147_v36, %v146_v34 }
  0xcc   :  { %v151_v39 = vsel %vm64_vm8, %v283_v21, %v148_v37 }
  0xcd   :  { %211 = vcosq.f32 %v151_v39 }
  0xce   :  { %213 = vsinq.f32 %v151_v39 }
  0xd7   :  { %v212_v43 = vpop.eup %211 }
  0xd8   :  { %v214_v44 = vpop.eup %213  ;;  %v163_v45 = vxor.u32 2147483648, %v212_v43 }
  0xd9   :  { %v160_v46 = vxor.u32 2147483648, %v214_v44 }
  0xda   :  { %v164_v47 = vsel %vm162_vm9, %v163_v45, %v214_v44 }
  0xdb   :  { %v161_v23 = vsel %vm159_vm10, %v212_v43, %v160_v46 }
  0xdc   :  { %v165_v48 = vsel %vm158_vm11, %v161_v23, %v164_v47 }
  0xdd   :  { %v166_v49 = vsel %vm155_vm12, nan, %v165_v48 }
  0xde   :  { %167 = vst [vmem:[#allocation2] sm:$0xff] %v166_v49 }
  0xdf   :  { %226 = shalt.err (!%p223_p4)
}
  0xe0   :  { %s227_s24 = scalar_lea.hbm %s318_s2, 128 }
  0xe1   :  { %p228_p5 = scmp.ne.s32.totalorder %s318_s2, %s227_s24  ;;  %p231_p6 = scmp.lt.u32.totalorder %s227_s24, %s318_s2 }
  0xe3   :  { %p233_p7 = pnand %p231_p6, %p228_p5 }
  0xe5   :  { %236 = shalt.err (!%p233_p7)
}
  0xe6   :  { %177 = dma.vmem_to_hbm [thread:$0]  %s175_s20, 128, %s318_s2, [#allocation3]  }
  0xe7   :  { %237 = dma.done.wait [#allocation3], 128  }
  0xe8   :  { %238 = vsyncadd [#allocation3], 4294967168 }
  0xe9   :  { %181 = vsyncpa [#allocation3], 1 }

</bundles_post_ra>
